<compile_context>
chip_gen: v6e
topology: v6e:2x2x1
jax: 0.10.0
libtpu: 0.0.40
codegen_flags: <defaults>
</compile_context>

<pallas_src>
import math

import jax
import jax.numpy as jnp
from jax.experimental import pallas as pl
from jax.experimental.pallas import tpu as pltpu


# ----------------------------- kernel -----------------------------

def rgcn_fused_kernel(adj_ref, h_ref, wc_ref, bc_ref, bias_ref, o_ref, acc_ref):
    """Per grid point (i, k):
         hs_k  = h[k_tile] @ Wc + bc                  (tk, hid)
         acc  += adj[i_tile, k_tile] @ hs_k           (tm, hid)
       At the last k: out[i_tile] = acc + bias.
    """
    k = pl.program_id(1)

    @pl.when(k == 0)
    def _init():
        acc_ref[...] = jnp.zeros_like(acc_ref)

    hs = (
        jnp.dot(h_ref[...], wc_ref[...], preferred_element_type=jnp.float32)
        + bc_ref[...]
    )
    acc_ref[...] += jnp.dot(adj_ref[...], hs, preferred_element_type=jnp.float32)

    @pl.when(k == pl.num_programs(1) - 1)
    def _finalize():
        o_ref[...] = (acc_ref[...] + bias_ref[...]).astype(o_ref.dtype)


# ----------------------------- wrapper -----------------------------

def _round_up(x, m):
    return (x + m - 1) // m * m


def rgcn_forward(h, adj, w_lin, b_lin, weight, bias, *, tm=128, tk=128):
    """h: [N, in_feat], adj: [N, N] dense float adjacency.
    w_lin: [hid, in_feat], b_lin: [hid], weight: [hid, hid], bias: [out]=[hid]."""
    N, in_feat = h.shape
    hid = w_lin.shape[0]
    out_feat = bias.shape[0]
    assert out_feat == hid, "bias/out_feat must match hid_feat for the final add"

    # Algebraic fusion (exact: no activation between linear / aggregate / transform).
    wc = (w_lin.T @ weight).astype(jnp.float32)        # [in_feat, hid]
    bc = (b_lin @ weight).reshape(1, hid).astype(jnp.float32)

    # Zero-pad to tile-aligned, lane-dense shapes. Zero padding is exact:
    # padded adj cols kill padded hs rows, padded Wc/bias cols keep padded
    # feature lanes at 0, padded output rows/cols are sliced off below.
    step = math.lcm(tm, tk)
    Np = _round_up(N, step)
    in_p = _round_up(in_feat, 128)
    hid_p = _round_up(hid, 128)

    adj_p = jnp.pad(adj.astype(jnp.float32), ((0, Np - N), (0, Np - N)))
    h_p = jnp.pad(h.astype(jnp.float32), ((0, Np - N), (0, in_p - in_feat)))
    wc_p = jnp.pad(wc, ((0, in_p - in_feat), (0, hid_p - hid)))
    bc_p = jnp.pad(bc, ((0, 0), (0, hid_p - hid)))
    bias_p = jnp.pad(
        bias.reshape(1, out_feat).astype(jnp.float32), ((0, 0), (0, hid_p - out_feat))
    )

    grid = (Np // tm, Np // tk)

    cost = pl.CostEstimate(
        flops=2 * Np * Np * hid_p + 2 * grid[0] * Np * in_p * hid_p,
        transcendentals=0,
        bytes_accessed=4 * (Np * Np + Np * in_p + Np * hid_p + in_p * hid_p),
    )

    out_p = pl.pallas_call(
        rgcn_fused_kernel,
        out_shape=jax.ShapeDtypeStruct((Np, hid_p), jnp.float32),
        grid=grid,
        in_specs=[
            pl.BlockSpec((tm, tk), lambda i, k: (i, k)),       # adj tile
            pl.BlockSpec((tk, in_p), lambda i, k: (k, 0)),     # h rows for this K tile
            pl.BlockSpec((in_p, hid_p), lambda i, k: (0, 0)),  # fused weight Wc
            pl.BlockSpec((1, hid_p), lambda i, k: (0, 0)),     # fused bias bc
            pl.BlockSpec((1, hid_p), lambda i, k: (0, 0)),     # output bias
        ],
        out_specs=pl.BlockSpec((tm, hid_p), lambda i, k: (i, 0)),
        scratch_shapes=[pltpu.VMEM((tm, hid_p), jnp.float32)],
        compiler_params=pltpu.CompilerParams(
            dimension_semantics=("parallel", "arbitrary"),
        ),
        cost_estimate=cost,
    )(adj_p, h_p, wc_p, bc_p, bias_p)

    return out_p[:N, :out_feat]


def rgcn_reference(h, adj, w_lin, b_lin, weight, bias):
    hs = h @ w_lin.T + b_lin
    return (adj @ hs) @ weight + bias


# ----------------------------- main -----------------------------

if __name__ == "__main__":
    key = jax.random.PRNGKey(0)
    N = 16            # number of nodes
    in_feat = 32
    hid_feat = 32
    out_feat = 32     # must equal hid_feat for the bias add (see module's shapes)
    num_relations = 4  # unused by any defined code path (forward is a stub)

    k1, k2, k3, k4, k5 = jax.random.split(key, 5)
    h = jax.random.normal(k1, (N, in_feat), dtype=jnp.float32)
    # deterministic dense adjacency (binary, row-normalized)
    adj_bin = (jax.random.uniform(k2, (N, N)) < 0.3).astype(jnp.float32)
    adj = adj_bin / jnp.maximum(adj_bin.sum(axis=1, keepdims=True), 1.0)

    # deterministic parameter init (synthetic, no checkpoint)
    w_lin = jax.random.normal(k3, (hid_feat, in_feat), dtype=jnp.float32) * (
        1.0 / jnp.sqrt(in_feat)
    )
    b_lin = jax.random.normal(k4, (hid_feat,), dtype=jnp.float32) * 0.01
    weight = jax.random.normal(k5, (hid_feat, hid_feat), dtype=jnp.float32) * (
        1.0 / jnp.sqrt(hid_feat)
    )
    bias = jnp.zeros((out_feat,), dtype=jnp.float32)  # nn.init.zeros_

    out = rgcn_forward(h, adj, w_lin, b_lin, weight, bias)
    out = jax.block_until_ready(out)

    ref = rgcn_reference(h, adj, w_lin, b_lin, weight, bias)
    assert out.shape == (N, out_feat)
    assert jnp.allclose(out, ref, atol=1e-4, rtol=1e-4), "mismatch vs JAX reference"

    print("KERNEL_OK")
</pallas_src>

<mosaic_0001>
module attributes {stable_mosaic.version = 11 : i64} {
  func.func @rgcn_fused_kernel(%arg0: i32, %arg1: i32, %arg2: memref<128x128xf32, #tpu.memory_space<vmem>>, %arg3: memref<128x128xf32, #tpu.memory_space<vmem>>, %arg4: memref<128x128xf32, #tpu.memory_space<vmem>>, %arg5: memref<1x128xf32, #tpu.memory_space<vmem>>, %arg6: memref<1x128xf32, #tpu.memory_space<vmem>>, %arg7: memref<128x128xf32, #tpu.memory_space<vmem>>, %arg8: memref<128x128xf32, #tpu.memory_space<vmem>>) attributes {dimension_semantics = [#tpu.dimension_semantics<parallel>, #tpu.dimension_semantics<arbitrary>], iteration_bounds = array<i64: 1, 1>, scalar_prefetch = 0 : i64, scratch_operands = 1 : i64, tpu.core_type = #tpu.core_type<tc>, window_params = [{transform_indices = @transform_0, window_bounds = array<i64: 128, 128>}, {transform_indices = @transform_1, window_bounds = array<i64: 128, 128>}, {pipeline_mode = #tpu.pipeline_mode<synchronous>, transform_indices = @transform_2, window_bounds = array<i64: 128, 128>}, {pipeline_mode = #tpu.pipeline_mode<synchronous>, transform_indices = @transform_3, window_bounds = array<i64: 1, 128>}, {pipeline_mode = #tpu.pipeline_mode<synchronous>, transform_indices = @transform_4, window_bounds = array<i64: 1, 128>}, {transform_indices = @transform_5, window_bounds = array<i64: 128, 128>}]} {
    %c0_i32 = arith.constant 0 : i32
    %0 = arith.cmpi eq, %arg1, %c0_i32 : i32
    %1 = arith.extui %0 : i1 to i32
    %c0_i32_0 = arith.constant 0 : i32
    %2 = arith.cmpi ne, %1, %c0_i32_0 : i32
    scf.if %2 {
      %cst_15 = arith.constant 0.000000e+00 : f32
      %17 = vector.broadcast %cst_15 : f32 to vector<128x128xf32>
      %c0_16 = arith.constant 0 : index
      %c0_17 = arith.constant 0 : index
      %18 = vector.load %arg8[%c0_16, %c0_17] : memref<128x128xf32, #tpu.memory_space<vmem>>, vector<128x128xf32>
      tpu.vector_store %arg8[%c0_16, %c0_17], %17 {strides = array<i32>} : memref<128x128xf32, #tpu.memory_space<vmem>>, vector<128x128xf32>,
    } else {
    }
    %c0 = arith.constant 0 : index
    %c0_1 = arith.constant 0 : index
    %3 = vector.load %arg3[%c0, %c0_1] : memref<128x128xf32, #tpu.memory_space<vmem>>, vector<128x128xf32>
    %c0_2 = arith.constant 0 : index
    %c0_3 = arith.constant 0 : index
    %4 = vector.load %arg4[%c0_2, %c0_3] : memref<128x128xf32, #tpu.memory_space<vmem>>, vector<128x128xf32>
    %cst = arith.constant dense<0.000000e+00> : vector<128x128xf32>
    %5 = tpu.matmul %3, %4, %cst {dimension_numbers = #tpu.dot_dimension_numbers<[1], [0], [0], [1], [0, 0, 1, 1], [], []>} : vector<128x128xf32>, vector<128x128xf32>, vector<128x128xf32> -> vector<128x128xf32>
    %c0_4 = arith.constant 0 : index
    %c0_5 = arith.constant 0 : index
    %6 = vector.load %arg5[%c0_4, %c0_5] : memref<1x128xf32, #tpu.memory_space<vmem>>, vector<1x128xf32>
    %7 = vector.broadcast %6 : vector<1x128xf32> to vector<128x128xf32>
    %8 = arith.addf %5, %7 : vector<128x128xf32>
    %c0_6 = arith.constant 0 : index
    %c0_7 = arith.constant 0 : index
    %9 = vector.load %arg8[%c0_6, %c0_7] : memref<128x128xf32, #tpu.memory_space<vmem>>, vector<128x128xf32>
    %c0_8 = arith.constant 0 : index
    %c0_9 = arith.constant 0 : index
    %10 = vector.load %arg2[%c0_8, %c0_9] : memref<128x128xf32, #tpu.memory_space<vmem>>, vector<128x128xf32>
    %cst_10 = arith.constant dense<0.000000e+00> : vector<128x128xf32>
    %11 = tpu.matmul %10, %8, %cst_10 {dimension_numbers = #tpu.dot_dimension_numbers<[1], [0], [0], [1], [0, 0, 1, 1], [], []>} : vector<128x128xf32>, vector<128x128xf32>, vector<128x128xf32> -> vector<128x128xf32>
    %12 = arith.addf %9, %11 : vector<128x128xf32>
    %c0_11 = arith.constant 0 : index
    %c0_12 = arith.constant 0 : index
    %13 = vector.load %arg8[%c0_11, %c0_12] : memref<128x128xf32, #tpu.memory_space<vmem>>, vector<128x128xf32>
    tpu.vector_store %arg8[%c0_11, %c0_12], %12 {strides = array<i32>} : memref<128x128xf32, #tpu.memory_space<vmem>>, vector<128x128xf32>,
    %c0_i32_13 = arith.constant 0 : i32
    %14 = arith.cmpi eq, %arg1, %c0_i32_13 : i32
    %15 = arith.extui %14 : i1 to i32
    %c0_i32_14 = arith.constant 0 : i32
    %16 = arith.cmpi ne, %15, %c0_i32_14 : i32
    scf.if %16 {
      %c0_15 = arith.constant 0 : index
      %c0_16 = arith.constant 0 : index
      %17 = vector.load %arg8[%c0_15, %c0_16] : memref<128x128xf32, #tpu.memory_space<vmem>>, vector<128x128xf32>
      %c0_17 = arith.constant 0 : index
      %c0_18 = arith.constant 0 : index
      %18 = vector.load %arg6[%c0_17, %c0_18] : memref<1x128xf32, #tpu.memory_space<vmem>>, vector<1x128xf32>
      %19 = vector.broadcast %18 : vector<1x128xf32> to vector<128x128xf32>
      %20 = arith.addf %17, %19 : vector<128x128xf32>
      %c0_19 = arith.constant 0 : index
      %c0_20 = arith.constant 0 : index
      %21 = vector.load %arg7[%c0_19, %c0_20] : memref<128x128xf32, #tpu.memory_space<vmem>>, vector<128x128xf32>
      tpu.vector_store %arg7[%c0_19, %c0_20], %20 {strides = array<i32>} : memref<128x128xf32, #tpu.memory_space<vmem>>, vector<128x128xf32>,
    } else {
    }
    return
  }
  func.func @transform_0(%arg0: i32, %arg1: i32) -> (i32, i32) {
    %c0_i32 = arith.constant 0 : i32
    return %arg0, %arg1 : i32, i32
  }
  func.func @transform_1(%arg0: i32, %arg1: i32) -> (i32, i32) {
    %c0_i32 = arith.constant 0 : i32
    %c0_i32_0 = arith.constant 0 : i32
    return %arg1, %c0_i32 : i32, i32
  }
  func.func @transform_2(%arg0: i32, %arg1: i32) -> (i32, i32) {
    %c0_i32 = arith.constant 0 : i32
    %c0_i32_0 = arith.constant 0 : i32
    %c0_i32_1 = arith.constant 0 : i32
    return %c0_i32, %c0_i32_0 : i32, i32
  }
  func.func @transform_3(%arg0: i32, %arg1: i32) -> (i32, i32) {
    %c0_i32 = arith.constant 0 : i32
    %c0_i32_0 = arith.constant 0 : i32
    %c0_i32_1 = arith.constant 0 : i32
    return %c0_i32, %c0_i32_0 : i32, i32
  }
  func.func @transform_4(%arg0: i32, %arg1: i32) -> (i32, i32) {
    %c0_i32 = arith.constant 0 : i32
    %c0_i32_0 = arith.constant 0 : i32
    %c0_i32_1 = arith.constant 0 : i32
    return %c0_i32, %c0_i32_0 : i32, i32
  }
  func.func @transform_5(%arg0: i32, %arg1: i32) -> (i32, i32) {
    %c0_i32 = arith.constant 0 : i32
    %c0_i32_0 = arith.constant 0 : i32
    return %arg0, %c0_i32 : i32, i32
  }
}

</mosaic_0001>

<bundles_post_ra>
// kernel: tpu_custom_call.1
= control target key start
LH: loop header
LB: loop body
LE: loop exit
PB: predicated region body
PF: predicated region fallthrough
CT: control target
= control target key end

     0   :  { %10 = vsyncpa [#allocation4], 0  ;;  %s887_s0 = inlined_call_operand.hbm [shape: f32[128,128], index: 0, kind: input, shape index: {}]   ;;  %s888_s1 = inlined_call_operand.hbm [shape: f32[128,128], index: 1, kind: input, shape index: {}]   ;;  %s889_s2 = inlined_call_operand.hbm [shape: f32[128,128], index: 2, kind: input, shape index: {}]   ;;  %s890_s3 = inlined_call_operand.vmem [shape: f32[1,128], index: 3, kind: input, shape index: {}]   ;;  %s891_s4 = inlined_call_operand.vmem [shape: f32[1,128], index: 4, kind: input, shape index: {}]   ;;  %s892_s5 = inlined_call_operand.hbm [shape: f32[128,128], index: 5, kind: output, shape index: {}]  }
   0x1   :  { %11 = vsyncpa [#allocation7], 0 }
   0x2   :  { %12 = vsyncpa [#allocation5], 0  ;;  %s821_s18 = smov [#allocation6]   ;;  %s822_s20 = smov [#allocation3]  }
   0x3   :  { %s30_s19 = sshll.u32 %s821_s18, 4  ;;  %s18_s21 = sshll.u32 %s822_s20, 4  ;;  %s31_s19 = int_to_ptr.vmem [resolvable:$true] %s30_s19  ;;  %s19_s21 = int_to_ptr.vmem [resolvable:$true] %s18_s21 }
   0x4   :  { %s743_s22 = scalar_lea.vmem %s31_s19, 2048  ;;  %p748_p1 = scmp.lt.s32.totalorder %s31_s19, %s31_s19 }
   0x5   :  { %p744_p0 = scmp.ne.s32.totalorder %s31_s19, %s743_s22  ;;  %p749_p2 = scmp.lt.s32.totalorder %s743_s22, %s743_s22 }
   0x7   :  { %p750_p3 = por %p749_p2, %p748_p1 }
   0x9   :  { %p751_p4 = pnand %p750_p3, %p744_p0 }
   0xb   :  { %754 = shalt.err (!%p751_p4)
}
   0xc   :  { %s823_s23 = smov 128   ;;  %s824_s24 = smov 8  }
   0xd   :  { %36 = dma.hbm_to_vmem [thread:$0]  %s888_s1, 2048, %s31_s19, [#allocation7], %s823_s23, %s823_s23, %s824_s24  }
   0xe   :  { %s763_s27 = scalar_lea.vmem %s19_s21, 2048  ;;  %p768_p6 = scmp.lt.s32.totalorder %s19_s21, %s19_s21 }
   0xf   :  { %p764_p5 = scmp.ne.s32.totalorder %s19_s21, %s763_s27  ;;  %p769_p7 = scmp.lt.s32.totalorder %s763_s27, %s763_s27 }
  0x11   :  { %p770_p8 = por %p769_p7, %p768_p6 }
  0x13   :  { %p771_p9 = pnand %p770_p8, %p764_p5 }
  0x15   :  { %774 = shalt.err (!%p771_p9)
}
  0x16   :  { %24 = dma.hbm_to_vmem [thread:$0]  %s887_s0, 2048, %s19_s21, [#allocation4], %s823_s23, %s823_s23, %s824_s24  }
  0x17   :  { %s825_s30 = smov [#allocation8]  }
  0x18   :  { %s42_s6 = sshll.u32 %s825_s30, 4  ;;  %s43_s6 = int_to_ptr.vmem [resolvable:$true] %s42_s6 }
  0x19   :  { %s783_s7 = scalar_lea.vmem %s43_s6, 2048  ;;  %p788_p11 = scmp.lt.s32.totalorder %s43_s6, %s43_s6 }
  0x1a   :  { %p784_p10 = scmp.ne.s32.totalorder %s43_s6, %s783_s7  ;;  %p789_p12 = scmp.lt.s32.totalorder %s783_s7, %s783_s7 }
  0x1c   :  { %p790_p13 = por %p789_p12, %p788_p11 }
  0x1e   :  { %p791_p0 = pnand %p790_p13, %p784_p10 }
  0x20   :  { %794 = shalt.err (!%p791_p0)
}
  0x21   :  { %48 = dma.hbm_to_vmem [thread:$0]  %s889_s2, 2048, %s43_s6, [#allocation7], %s823_s23, %s823_s23, %s824_s24  }
  0x22   :  { %815 = dma.done.wait [#allocation4], 2048  }
  0x23   :  { %816 = vsyncadd [#allocation4], 4294965248 }
  0x24   :  { %817 = dma.done.wait [#allocation7], 4096  }
  0x25   :  { %818 = vsyncadd [#allocation7], 4294963200  ;;  %v113_v0 = vld [vmem:[#allocation8 + $0x78] sm:$0xff]  ;;  %v112_v1 = vld [vmem:[#allocation8 + $0x70] sm:$0xff] }
  0x26   :  { %617 = vmatprep.subr.mxu0 %v113_v0  ;;  %v111_v2 = vld [vmem:[#allocation8 + $0x68] sm:$0xff]  ;;  %v110_v3 = vld [vmem:[#allocation8 + $0x60] sm:$0xff]  ;;  %v109_v5 = vld [vmem:[#allocation8 + $0x58] sm:$0xff] }
  0x27   :  { %618 = vmatpush3.msra.mxu0 %v113_v0  ;;  %v82_v4 = vld [vmem:[#allocation6] sm:$0xff]  ;;  %v108_v6 = vld [vmem:[#allocation8 + $0x50] sm:$0xff]  ;;  %v107_v7 = vld [vmem:[#allocation8 + $0x48] sm:$0xff] }
  0x28   :  { %619 = vmatprep.subr.mxu0 %v112_v1  ;;  %649 = vmatprep.mubr.f32.mxu0 %v82_v4  ;;  %v106_v8 = vld [vmem:[#allocation8 + $0x40] sm:$0xff]  ;;  %v105_v9 = vld [vmem:[#allocation8 + $0x38] sm:$0xff]  ;;  %v104_v10 = vld [vmem:[#allocation8 + $0x30] sm:$0xff] }
  0x29   :  { %620 = vmatpush3.msra.mxu0 %v112_v1  ;;  %v103_v11 = vld [vmem:[#allocation8 + $0x28] sm:$0xff]  ;;  %v102_v12 = vld [vmem:[#allocation8 + $0x20] sm:$0xff]  ;;  %v101_v13 = vld [vmem:[#allocation8 + $0x18] sm:$0xff] }
  0x2a   :  { %621 = vmatprep.subr.mxu0 %v111_v2  ;;  %v100_v14 = vld [vmem:[#allocation8 + $0x10] sm:$0xff]  ;;  %v99_v15 = vld [vmem:[#allocation8 + $0x8] sm:$0xff]  ;;  %v98_v16 = vld [vmem:[#allocation8] sm:$0xff] }
  0x2b   :  { %622 = vmatpush3.msra.mxu0 %v111_v2  ;;  %v83_v17 = vld [vmem:[#allocation6 + $0x8] sm:$0xff]  ;;  %v84_v18 = vld [vmem:[#allocation6 + $0x10] sm:$0xff]  ;;  %v85_v19 = vld [vmem:[#allocation6 + $0x18] sm:$0xff] }
  0x2c   :  { %623 = vmatprep.subr.mxu0 %v110_v3  ;;  %v86_v20 = vld [vmem:[#allocation6 + $0x20] sm:$0xff]  ;;  %v87_v21 = vld [vmem:[#allocation6 + $0x28] sm:$0xff]  ;;  %v88_v22 = vld [vmem:[#allocation6 + $0x30] sm:$0xff] }
  0x2d   :  { %624 = vmatpush3.msra.mxu0 %v110_v3  ;;  %v89_v23 = vld [vmem:[#allocation6 + $0x38] sm:$0xff]  ;;  %v90_v24 = vld [vmem:[#allocation6 + $0x40] sm:$0xff]  ;;  %v91_v25 = vld [vmem:[#allocation6 + $0x48] sm:$0xff] }
  0x2e   :  { %625 = vmatprep.subr.mxu0 %v109_v5  ;;  %v92_v26 = vld [vmem:[#allocation6 + $0x50] sm:$0xff]  ;;  %v93_v27 = vld [vmem:[#allocation6 + $0x58] sm:$0xff]  ;;  %v94_v28 = vld [vmem:[#allocation6 + $0x60] sm:$0xff] }
  0x2f   :  { %626 = vmatpush3.msra.mxu0 %v109_v5  ;;  %v95_v29 = vld [vmem:[#allocation6 + $0x68] sm:$0xff]  ;;  %v96_v30 = vld [vmem:[#allocation6 + $0x70] sm:$0xff]  ;;  %v97_v31 = vld [vmem:[#allocation6 + $0x78] sm:$0xff] }
  0x30   :  { %627 = vmatprep.subr.mxu0 %v108_v6  ;;  %v282_v32 = vld [vmem:[#allocation3] sm:$0xff]  ;;  %v283_v2 = vld [vmem:[#allocation3 + $0x8] sm:$0xff]  ;;  %v284_v3 = vld [vmem:[#allocation3 + $0x10] sm:$0xff] }
  0x31   :  { %628 = vmatpush3.msra.mxu0 %v108_v6  ;;  %705 = vmatprep.mubr.f32.mxu1 %v282_v32  ;;  %v551_v47 = vld [vmem:[%s890_s3] ss:$0 sm:$0xff]  ;;  %v285_v4 = vld [vmem:[#allocation3 + $0x18] sm:$0xff]  ;;  %v287_v6 = vld [vmem:[#allocation3 + $0x28] sm:$0xff] }
  0x32   :  { %629 = vmatprep.subr.mxu0 %v107_v7  ;;  %v286_v5 = vld [vmem:[#allocation3 + $0x20] sm:$0xff] }
  0x33   :  { %630 = vmatpush3.msra.mxu0 %v107_v7  ;;  %v288_v7 = vld [vmem:[#allocation3 + $0x30] sm:$0xff] }
  0x34   :  { %631 = vmatprep.subr.mxu0 %v106_v8 }
  0x35   :  { %632 = vmatpush3.msra.mxu0 %v106_v8  ;;  %v289_v8 = vld [vmem:[#allocation3 + $0x38] sm:$0xff] }
  0x36   :  { %633 = vmatprep.subr.mxu0 %v105_v9 }
  0x37   :  { %634 = vmatpush3.msra.mxu0 %v105_v9  ;;  %v290_v9 = vld [vmem:[#allocation3 + $0x40] sm:$0xff] }
  0x38   :  { %635 = vmatprep.subr.mxu0 %v104_v10 }
  0x39   :  { %636 = vmatpush3.msra.mxu0 %v104_v10  ;;  %v291_v10 = vld [vmem:[#allocation3 + $0x48] sm:$0xff] }
  0x3a   :  { %637 = vmatprep.subr.mxu0 %v103_v11 }
  0x3b   :  { %638 = vmatpush3.msra.mxu0 %v103_v11  ;;  %v292_v11 = vld [vmem:[#allocation3 + $0x50] sm:$0xff] }
  0x3c   :  { %639 = vmatprep.subr.mxu0 %v102_v12 }
  0x3d   :  { %640 = vmatpush3.msra.mxu0 %v102_v12  ;;  %v293_v12 = vld [vmem:[#allocation3 + $0x58] sm:$0xff] }
  0x3e   :  { %641 = vmatprep.subr.mxu0 %v101_v13 }
  0x3f   :  { %642 = vmatpush3.msra.mxu0 %v101_v13  ;;  %v294_v13 = vld [vmem:[#allocation3 + $0x60] sm:$0xff] }
  0x40   :  { %643 = vmatprep.subr.mxu0 %v100_v14 }
  0x41   :  { %644 = vmatpush3.msra.mxu0 %v100_v14  ;;  %v295_v14 = vld [vmem:[#allocation3 + $0x68] sm:$0xff] }
  0x42   :  { %645 = vmatprep.subr.mxu0 %v99_v15 }
  0x43   :  { %646 = vmatpush3.msra.mxu0 %v99_v15  ;;  %v296_v15 = vld [vmem:[#allocation3 + $0x70] sm:$0xff] }
  0x44   :  { %647 = vmatprep.subr.mxu0 %v98_v16 }
  0x45   :  { %648 = vmatpush3.msra.mxu0 %v98_v16  ;;  %v297_v16 = vld [vmem:[#allocation3 + $0x78] sm:$0xff] }
  0x46   :  { %650 = vmatmul.mubr.f32.vlgmr.msra.gmra.mxu0 %v83_v17  ;;  %v552_v17 = vld [vmem:[%s891_s4] ss:$0 sm:$0xff]  ;;  %s826_s4 = smov [#allocation9]  }
  0x47   :  { %652 = vmatprep.mubr.f32.mxu0 %v84_v18  ;;  %s538_s10 = sshll.u32 %s826_s4, 4  ;;  %s539_s10 = int_to_ptr.vmem [resolvable:$true] %s538_s10 }
  0x48   :  { %s795_s11 = scalar_lea.vmem %s539_s10, 2048  ;;  %p800_p2 = scmp.lt.s32.totalorder %s539_s10, %s539_s10 }
  0x49   :  { %p796_p1 = scmp.ne.s32.totalorder %s539_s10, %s795_s11  ;;  %p801_p3 = scmp.lt.s32.totalorder %s795_s11, %s795_s11 }
  0x4a   :  { %653 = vmatmul.mubr.f32.gmra.mxu0 %v85_v19 }
  0x4b   :  { %655 = vmatprep.mubr.f32.mxu0 %v86_v20  ;;  %p802_p4 = por %p801_p3, %p800_p2 }
  0x4d   :  { %p803_p5 = pnand %p802_p4, %p796_p1 }
  0x4e   :  { %656 = vmatmul.mubr.f32.gmra.mxu0 %v87_v21 }
  0x4f   :  { %658 = vmatprep.mubr.f32.mxu0 %v88_v22 }
  0x52   :  { %659 = vmatmul.mubr.f32.gmra.mxu0 %v89_v23 }
  0x53   :  { %661 = vmatprep.mubr.f32.mxu0 %v90_v24 }
  0x56   :  { %662 = vmatmul.mubr.f32.gmra.mxu0 %v91_v25 }
  0x57   :  { %664 = vmatprep.mubr.f32.mxu0 %v92_v26 }
  0x5a   :  { %665 = vmatmul.mubr.f32.gmra.mxu0 %v93_v27 }
  0x5b   :  { %667 = vmatprep.mubr.f32.mxu0 %v94_v28 }
  0x5e   :  { %668 = vmatmul.mubr.f32.gmra.mxu0 %v95_v29 }
  0x5f   :  { %670 = vmatprep.mubr.f32.mxu0 %v96_v30 }
  0x62   :  { %671 = vmatmul.mubr.f32.gmra.mxu0 %v97_v31 }
 0x106   :  { %v651_v33 = vpop.f32.mrf.mxu0 }
 0x107   :  { %v193_v0 = vadd.f32 %v651_v33, %v551_v47 }
 0x108   :  { %v187_v34 = vpop.f32.mrf.mxu0 }
 0x109   :  { %v188_v1 = vadd.f32 %v551_v47, %v187_v34 }
 0x10a   :  { %v654_v35 = vpop.f32.mrf.mxu0 }
 0x10b   :  { %v203_v62 = vadd.f32 %v654_v35, %v551_v47 }
 0x10c   :  { %v197_v36 = vpop.f32.mrf.mxu0 }
 0x10d   :  { %v198_v63 = vadd.f32 %v551_v47, %v197_v36 }
 0x10e   :  { %v657_v37 = vpop.f32.mrf.mxu0 }
 0x10f   :  { %v213_v60 = vadd.f32 %v657_v37, %v551_v47 }
 0x110   :  { %v207_v38 = vpop.f32.mrf.mxu0 }
 0x111   :  { %v208_v61 = vadd.f32 %v551_v47, %v207_v38 }
 0x112   :  { %v660_v39 = vpop.f32.mrf.mxu0 }
 0x113   :  { %v223_v58 = vadd.f32 %v660_v39, %v551_v47 }
 0x114   :  { %v217_v40 = vpop.f32.mrf.mxu0 }
 0x115   :  { %v218_v59 = vadd.f32 %v551_v47, %v217_v40 }
 0x116   :  { %v663_v41 = vpop.f32.mrf.mxu0 }
 0x117   :  { %v233_v56 = vadd.f32 %v663_v41, %v551_v47 }
 0x118   :  { %v227_v42 = vpop.f32.mrf.mxu0 }
 0x119   :  { %v228_v57 = vadd.f32 %v551_v47, %v227_v42 }
 0x11a   :  { %v666_v43 = vpop.f32.mrf.mxu0 }
 0x11b   :  { %v243_v54 = vadd.f32 %v666_v43, %v551_v47 }
 0x11c   :  { %v237_v44 = vpop.f32.mrf.mxu0 }
 0x11d   :  { %v238_v55 = vadd.f32 %v551_v47, %v237_v44 }
 0x11e   :  { %v669_v45 = vpop.f32.mrf.mxu0 }
 0x11f   :  { %v253_v52 = vadd.f32 %v669_v45, %v551_v47 }
 0x120   :  { %v247_v46 = vpop.f32.mrf.mxu0 }
 0x121   :  { %v248_v53 = vadd.f32 %v551_v47, %v247_v46 }
 0x122   :  { %v672_v48 = vpop.f32.mrf.mxu0 }
 0x123   :  { %v263_v49 = vadd.f32 %v672_v48, %v551_v47 }
 0x124   :  { %v257_v50 = vpop.f32.mrf.mxu0 }
 0x125   :  { %v258_v51 = vadd.f32 %v551_v47, %v257_v50  ;;  %673 = vmatprep.subr.mxu1 %v263_v49 }
 0x126   :  { %674 = vmatpush3.msra.mxu1 %v263_v49 }
 0x127   :  { %675 = vmatprep.subr.mxu1 %v258_v51 }
 0x128   :  { %676 = vmatpush3.msra.mxu1 %v258_v51 }
 0x129   :  { %677 = vmatprep.subr.mxu1 %v253_v52 }
 0x12a   :  { %678 = vmatpush3.msra.mxu1 %v253_v52 }
 0x12b   :  { %679 = vmatprep.subr.mxu1 %v248_v53 }
 0x12c   :  { %680 = vmatpush3.msra.mxu1 %v248_v53 }
 0x12d   :  { %681 = vmatprep.subr.mxu1 %v243_v54 }
 0x12e   :  { %682 = vmatpush3.msra.mxu1 %v243_v54 }
 0x12f   :  { %683 = vmatprep.subr.mxu1 %v238_v55 }
 0x130   :  { %684 = vmatpush3.msra.mxu1 %v238_v55 }
 0x131   :  { %685 = vmatprep.subr.mxu1 %v233_v56 }
 0x132   :  { %686 = vmatpush3.msra.mxu1 %v233_v56 }
 0x133   :  { %687 = vmatprep.subr.mxu1 %v228_v57 }
 0x134   :  { %688 = vmatpush3.msra.mxu1 %v228_v57 }
 0x135   :  { %689 = vmatprep.subr.mxu1 %v223_v58 }
 0x136   :  { %690 = vmatpush3.msra.mxu1 %v223_v58 }
 0x137   :  { %691 = vmatprep.subr.mxu1 %v218_v59 }
 0x138   :  { %692 = vmatpush3.msra.mxu1 %v218_v59 }
 0x139   :  { %693 = vmatprep.subr.mxu1 %v213_v60 }
 0x13a   :  { %694 = vmatpush3.msra.mxu1 %v213_v60 }
 0x13b   :  { %695 = vmatprep.subr.mxu1 %v208_v61 }
 0x13c   :  { %696 = vmatpush3.msra.mxu1 %v208_v61 }
 0x13d   :  { %697 = vmatprep.subr.mxu1 %v203_v62 }
 0x13e   :  { %698 = vmatpush3.msra.mxu1 %v203_v62 }
 0x13f   :  { %699 = vmatprep.subr.mxu1 %v198_v63 }
 0x140   :  { %700 = vmatpush3.msra.mxu1 %v198_v63 }
 0x141   :  { %701 = vmatprep.subr.mxu1 %v193_v0 }
 0x142   :  { %702 = vmatpush3.msra.mxu1 %v193_v0 }
 0x143   :  { %703 = vmatprep.subr.mxu1 %v188_v1 }
 0x144   :  { %704 = vmatpush3.msra.mxu1 %v188_v1 }
 0x145   :  { %706 = vmatmul.mubr.f32.vlgmr.msra.gmra.mxu1 %v283_v2 }
 0x146   :  { %708 = vmatprep.mubr.f32.mxu1 %v284_v3 }
 0x149   :  { %709 = vmatmul.mubr.f32.gmra.mxu1 %v285_v4 }
 0x14a   :  { %711 = vmatprep.mubr.f32.mxu1 %v286_v5 }
 0x14d   :  { %712 = vmatmul.mubr.f32.gmra.mxu1 %v287_v6 }
 0x14e   :  { %714 = vmatprep.mubr.f32.mxu1 %v288_v7 }
 0x151   :  { %715 = vmatmul.mubr.f32.gmra.mxu1 %v289_v8 }
 0x152   :  { %717 = vmatprep.mubr.f32.mxu1 %v290_v9 }
 0x155   :  { %718 = vmatmul.mubr.f32.gmra.mxu1 %v291_v10 }
 0x156   :  { %720 = vmatprep.mubr.f32.mxu1 %v292_v11 }
 0x159   :  { %721 = vmatmul.mubr.f32.gmra.mxu1 %v293_v12 }
 0x15a   :  { %723 = vmatprep.mubr.f32.mxu1 %v294_v13 }
 0x15d   :  { %724 = vmatmul.mubr.f32.gmra.mxu1 %v295_v14 }
 0x15e   :  { %726 = vmatprep.mubr.f32.mxu1 %v296_v15 }
 0x161   :  { %727 = vmatmul.mubr.f32.gmra.mxu1 %v297_v16 }
 0x205   :  { %v707_v18 = vpop.f32.mrf.mxu1 }
 0x206   :  { %v502_v19 = vadd.f32 %v707_v18, %v552_v17 }
 0x207   :  { %v364_v20 = vpop.f32.mrf.mxu1 }
 0x208   :  { %518 = vst [vmem:[#allocation9 + $0x8] sm:$0xff] %v502_v19  ;;  %v501_v21 = vadd.f32 %v552_v17, %v364_v20 }
 0x209   :  { %v710_v22 = vpop.f32.mrf.mxu1 }
 0x20a   :  { %517 = vst [vmem:[#allocation9] sm:$0xff] %v501_v21  ;;  %v504_v23 = vadd.f32 %v710_v22, %v552_v17 }
 0x20b   :  { %v374_v24 = vpop.f32.mrf.mxu1 }
 0x20c   :  { %520 = vst [vmem:[#allocation9 + $0x18] sm:$0xff] %v504_v23  ;;  %v503_v25 = vadd.f32 %v552_v17, %v374_v24 }
 0x20d   :  { %v713_v26 = vpop.f32.mrf.mxu1 }
 0x20e   :  { %519 = vst [vmem:[#allocation9 + $0x10] sm:$0xff] %v503_v25  ;;  %v506_v27 = vadd.f32 %v713_v26, %v552_v17 }
 0x20f   :  { %v384_v28 = vpop.f32.mrf.mxu1 }
 0x210   :  { %522 = vst [vmem:[#allocation9 + $0x28] sm:$0xff] %v506_v27  ;;  %v505_v29 = vadd.f32 %v552_v17, %v384_v28 }
 0x211   :  { %v716_v30 = vpop.f32.mrf.mxu1 }
 0x212   :  { %521 = vst [vmem:[#allocation9 + $0x20] sm:$0xff] %v505_v29  ;;  %v508_v31 = vadd.f32 %v716_v30, %v552_v17 }
 0x213   :  { %v394_v32 = vpop.f32.mrf.mxu1 }
 0x214   :  { %524 = vst [vmem:[#allocation9 + $0x38] sm:$0xff] %v508_v31  ;;  %v507_v33 = vadd.f32 %v552_v17, %v394_v32 }
 0x215   :  { %v719_v34 = vpop.f32.mrf.mxu1 }
 0x216   :  { %523 = vst [vmem:[#allocation9 + $0x30] sm:$0xff] %v507_v33  ;;  %v510_v35 = vadd.f32 %v719_v34, %v552_v17 }
 0x217   :  { %v404_v36 = vpop.f32.mrf.mxu1 }
 0x218   :  { %526 = vst [vmem:[#allocation9 + $0x48] sm:$0xff] %v510_v35  ;;  %v509_v37 = vadd.f32 %v552_v17, %v404_v36 }
 0x219   :  { %v722_v38 = vpop.f32.mrf.mxu1 }
 0x21a   :  { %525 = vst [vmem:[#allocation9 + $0x40] sm:$0xff] %v509_v37  ;;  %v512_v39 = vadd.f32 %v722_v38, %v552_v17 }
 0x21b   :  { %v414_v40 = vpop.f32.mrf.mxu1 }
 0x21c   :  { %528 = vst [vmem:[#allocation9 + $0x58] sm:$0xff] %v512_v39  ;;  %v511_v41 = vadd.f32 %v552_v17, %v414_v40 }
 0x21d   :  { %v725_v42 = vpop.f32.mrf.mxu1 }
 0x21e   :  { %527 = vst [vmem:[#allocation9 + $0x50] sm:$0xff] %v511_v41  ;;  %v514_v43 = vadd.f32 %v725_v42, %v552_v17 }
 0x21f   :  { %v424_v44 = vpop.f32.mrf.mxu1 }
 0x220   :  { %530 = vst [vmem:[#allocation9 + $0x68] sm:$0xff] %v514_v43  ;;  %v513_v45 = vadd.f32 %v552_v17, %v424_v44 }
 0x221   :  { %v728_v46 = vpop.f32.mrf.mxu1 }
 0x222   :  { %529 = vst [vmem:[#allocation9 + $0x60] sm:$0xff] %v513_v45  ;;  %v516_v47 = vadd.f32 %v728_v46, %v552_v17 }
 0x223   :  { %v434_v48 = vpop.f32.mrf.mxu1 }
 0x224   :  { %532 = vst [vmem:[#allocation9 + $0x78] sm:$0xff] %v516_v47  ;;  %v515_v49 = vadd.f32 %v552_v17, %v434_v48 }
 0x226   :  { %531 = vst [vmem:[#allocation9 + $0x70] sm:$0xff] %v515_v49 }
 0x227   :  { %806 = shalt.err (!%p803_p5)
}
 0x228   :  { %544 = dma.vmem_to_hbm [thread:$0]  %s539_s10, 2048, %s892_s5, [#allocation5], %s823_s23, %s823_s23, %s824_s24  }
 0x229   :  { %819 = dma.done.wait [#allocation5], 2048  }
 0x22a   :  { %820 = vsyncadd [#allocation5], 4294965248 }
 0x22b   :  { %548 = vsyncpa [#allocation4], 1 }
 0x22c   :  { %549 = vsyncpa [#allocation7], 1 }
 0x22d   :  { %550 = vsyncpa [#allocation5], 1 }

</bundles_post_ra>
